<compile_context>
chip_gen: v7x
topology: tpu7x:2x2x1
jax: 0.10.0
libtpu: 0.0.40
codegen_flags: <defaults>
</compile_context>

<pallas_src>
import math
from functools import partial

import jax
import jax.numpy as jnp
from jax import lax
from jax.experimental import pallas as pl
from jax.experimental.pallas import tpu as pltpu

_MIB = 1024 * 1024


# ------------------------------ helpers --------------------------------------

def _vmem_limit(nbytes):
    # At least the default scoped budget, never above v7x physical VMEM.
    return int(min(max(nbytes, 16 * _MIB), 64 * _MIB))


def _choose_tile(total, target, multiple=16):
    """Largest divisor of `total` that is <= target and a multiple of `multiple`
    (bf16 sublane-friendly); then relax the multiple (>=8 or full extent) while
    capping at 2*target so ragged sizes cannot silently blow the VMEM budget."""
    if total <= target:
        return total
    for t in range(target, multiple - 1, -1):
        if total % t == 0 and t % multiple == 0:
            return t
    cap = min(2 * target, total)
    for t in range(cap, 0, -1):
        if total % t == 0 and (t % 8 == 0 or t == total):
            return t
    # TODO(synk): pad ragged sequence lengths instead of full-extent fallback.
    return total


def _head_group(num_heads, d_k, lane_target=128):
    """Heads per grid step so the lane block (hg * d_k) is lane_target-aligned
    or the full d_model (always legal via the full-extent rule)."""
    if d_k % lane_target == 0:
        return 1
    if lane_target % d_k == 0 and num_heads % (lane_target // d_k) == 0:
        return lane_target // d_k
    return num_heads


# --------------------------- projection kernels -------------------------------

def _qkv_proj_kernel(x_ref, wq_ref, wk_ref, wv_ref, bq_ref, bk_ref, bv_ref,
                     q_ref, k_ref, v_ref):
    # x: (tm, D) f32 -> bf16 once; w*: (D, D) bf16; b*: (1, D) f32. One activation
    # read, three bf16 MXU matmuls with f32 accumulation, bf16 outputs.
    x = x_ref[...].astype(jnp.bfloat16)
    q_ref[...] = (jnp.dot(x, wq_ref[...], preferred_element_type=jnp.float32)
                  + bq_ref[...]).astype(q_ref.dtype)
    k_ref[...] = (jnp.dot(x, wk_ref[...], preferred_element_type=jnp.float32)
                  + bk_ref[...]).astype(k_ref.dtype)
    v_ref[...] = (jnp.dot(x, wv_ref[...], preferred_element_type=jnp.float32)
                  + bv_ref[...]).astype(v_ref.dtype)


def qkv_projection(x2d, wq, wk, wv, bq, bk, bv, *, row_tile=256,
                   out_dtype=jnp.bfloat16):
    n, d = x2d.shape
    tm = _choose_tile(n, row_tile)
    x_spec = pl.BlockSpec((tm, d), lambda i: (i, 0))
    w_spec = pl.BlockSpec((d, d), lambda i: (0, 0))
    b_spec = pl.BlockSpec((1, d), lambda i: (0, 0))
    o_spec = pl.BlockSpec((tm, d), lambda i: (i, 0))

    x_b = jnp.dtype(x2d.dtype).itemsize
    est = (3 * d * d * 2 + 3 * d * 4                      # resident bf16 weights + f32 biases
           + 2 * (tm * d * x_b + 3 * tm * d * 2)          # double-buffered x tile + 3 bf16 outs
           + _MIB)
    return pl.pallas_call(
        _qkv_proj_kernel,
        grid=(n // tm,),
        in_specs=[x_spec, w_spec, w_spec, w_spec, b_spec, b_spec, b_spec],
        out_specs=(o_spec, o_spec, o_spec),
        out_shape=tuple(jax.ShapeDtypeStruct((n, d), out_dtype) for _ in range(3)),
        compiler_params=pltpu.CompilerParams(
            dimension_semantics=("parallel",),
            vmem_limit_bytes=_vmem_limit(est)),
    )(x2d, wq, wk, wv, bq, bk, bv)


def _linear_kernel(x_ref, w_ref, b_ref, o_ref):
    x = x_ref[...].astype(jnp.bfloat16)     # no-op when x is already bf16
    o_ref[...] = (jnp.dot(x, w_ref[...], preferred_element_type=jnp.float32)
                  + b_ref[...]).astype(o_ref.dtype)


def linear(x2d, w, b, *, row_tile=256, out_dtype=None):
    n, d_in = x2d.shape
    d_out = w.shape[1]
    out_dtype = x2d.dtype if out_dtype is None else out_dtype
    tm = _choose_tile(n, row_tile)

    x_b = jnp.dtype(x2d.dtype).itemsize
    o_b = jnp.dtype(out_dtype).itemsize
    est = (d_in * d_out * 2 + d_out * 4
           + 2 * (tm * d_in * x_b + tm * d_out * o_b) + _MIB)
    return pl.pallas_call(
        _linear_kernel,
        grid=(n // tm,),
        in_specs=[pl.BlockSpec((tm, d_in), lambda i: (i, 0)),
                  pl.BlockSpec((d_in, d_out), lambda i: (0, 0)),
                  pl.BlockSpec((1, d_out), lambda i: (0, 0))],
        out_specs=pl.BlockSpec((tm, d_out), lambda i: (i, 0)),
        out_shape=jax.ShapeDtypeStruct((n, d_out), out_dtype),
        compiler_params=pltpu.CompilerParams(
            dimension_semantics=("parallel",),
            vmem_limit_bytes=_vmem_limit(est)),
    )(x2d, w, b)


# --------------------------- attention kernel ---------------------------------

def _mha_attention_kernel(q_ref, k_ref, v_ref, o_ref, *maybe_attn,
                          heads_blk, d_k):
    # q_ref: (tq, hg*d_k) bf16 — already scaled by 1/sqrt(d_k) (folded into Wq).
    # k_ref, v_ref: (Sk, hg*d_k) bf16 (resident across q tiles).
    # o_ref: (tq, hg*d_k); optional a_ref: (hg, tq, Sk).
    a_ref = maybe_attn[0] if maybe_attn else None
    q = q_ref[...]
    k = k_ref[...]
    v = v_ref[...]
    # TODO(synk): on v6e/v7x a single head-batched dot_general could replace this
    # unrolled per-head loop; kept unrolled for small head groups / portability.
    for h in range(heads_blk):
        sl = slice(h * d_k, (h + 1) * d_k)
        # q @ k.T without materializing a transpose: contract the last axes.
        scores = lax.dot_general(q[:, sl], k[:, sl], (((1,), (1,)), ((), ())),
                                 preferred_element_type=jnp.float32)      # (tq, Sk)
        m = jnp.max(scores, axis=-1, keepdims=True)
        p = jnp.exp(scores - m)
        denom = jnp.sum(p, axis=-1, keepdims=True)
        attn = p * pl.reciprocal(denom, approx=True)                      # EUP slot
        attn_b = attn.astype(jnp.bfloat16)
        if a_ref is not None:
            a_ref[h, :, :] = attn_b.astype(a_ref.dtype)
        # Per-head store into the output lane slice (no concat epilogue).
        o_ref[:, sl] = jnp.dot(attn_b, v[:, sl],
                               preferred_element_type=jnp.float32).astype(o_ref.dtype)


def scaled_dot_product_attention(q, k, v, num_heads, *, q_tile=128,
                                 lane_target=128, return_attn=True,
                                 attn_dtype=jnp.bfloat16):
    """q: (B, Sq, D), k/v: (B, Sk, D), heads packed along D.
    Returns (out (B, Sq, D) same dtype as q, attn (B, H, Sq, Sk) in attn_dtype or None)."""
    B, Sq, D = q.shape
    _, Sk, _ = k.shape
    d_k = D // num_heads

    hg = _head_group(num_heads, d_k, lane_target)   # heads per grid step
    G = num_heads // hg
    tq = _choose_tile(Sq, q_tile)                   # bound VMEM for long sequences
    T = Sq // tq
    lane_blk = hg * d_k

    q_spec = pl.BlockSpec((None, tq, lane_blk), lambda b, g, t: (b, t, g))
    kv_spec = pl.BlockSpec((None, Sk, lane_blk), lambda b, g, t: (b, 0, g))
    o_spec = pl.BlockSpec((None, tq, lane_blk), lambda b, g, t: (b, t, g))
    o_sd = jax.ShapeDtypeStruct((B, Sq, D), q.dtype)

    eb = jnp.dtype(q.dtype).itemsize
    per_step = (tq * lane_blk + 2 * Sk * lane_blk + tq * lane_blk) * eb
    if return_attn:
        a_spec = pl.BlockSpec((None, hg, tq, Sk), lambda b, g, t: (b, g, t, 0))
        a_sd = jax.ShapeDtypeStruct((B, num_heads, Sq, Sk), attn_dtype)
        out_specs = (o_spec, a_spec)
        out_shape = (o_sd, a_sd)
        per_step += hg * tq * Sk * jnp.dtype(attn_dtype).itemsize
    else:
        out_specs = o_spec
        out_shape = o_sd
    # double-buffered q/k/v/o(/attn) blocks + live f32 scores/probs + slack.
    est = 2 * per_step + 2 * tq * Sk * 4 + _MIB

    result = pl.pallas_call(
        partial(_mha_attention_kernel, heads_blk=hg, d_k=d_k),
        # T innermost: K/V index_map is constant in t, so the full-Sk K/V block
        # stays resident across consecutive q tiles (megacore shards B/G).
        grid=(B, G, T),
        in_specs=[q_spec, kv_spec, kv_spec],
        out_specs=out_specs,
        out_shape=out_shape,
        compiler_params=pltpu.CompilerParams(
            dimension_semantics=("parallel", "parallel", "parallel"),
            vmem_limit_bytes=_vmem_limit(est)),
    )(q, k, v)

    if return_attn:
        out, attn = result
        return out, attn
    return result, None


# ----------------------------- module wrapper ----------------------------------

class MultiHeadAttentionPallas:
    def __init__(self, d_model, num_heads, key):
        assert d_model % num_heads == 0
        self.d_model = d_model
        self.num_heads = num_heads
        self.d_k = d_model // num_heads

        # Deterministic init mimicking nn.Linear's U(-1/sqrt(in), 1/sqrt(in)).
        bound = 1.0 / math.sqrt(d_model)
        keys = jax.random.split(key, 8)

        def init_linear(kw, kb):
            # Weight stored transposed to (in, out) so the kernel does x @ W.
            w = jax.random.uniform(kw, (d_model, d_model), jnp.float32, -bound, bound)
            b = jax.random.uniform(kb, (1, d_model), jnp.float32, -bound, bound)
            return w, b

        # f32 "master" parameters (used by the pure-JAX reference).
        self.wq, self.bq = init_linear(keys[0], keys[1])
        self.wk, self.bk = init_linear(keys[2], keys[3])
        self.wv, self.bv = init_linear(keys[4], keys[5])
        self.wo, self.bo = init_linear(keys[6], keys[7])

        # Kernel-side parameters: bf16 weights (native MXU rate, half the resident
        # VMEM / weight DMA), f32 biases added to the f32 accumulator, and the
        # 1/sqrt(d_k) attention scale folded into Wq/bq at zero runtime cost.
        scale = 1.0 / math.sqrt(self.d_k)
        self.wq_k = (self.wq * scale).astype(jnp.bfloat16)
        self.bq_k = self.bq * scale
        self.wk_k = self.wk.astype(jnp.bfloat16)
        self.bk_k = self.bk
        self.wv_k = self.wv.astype(jnp.bfloat16)
        self.bv_k = self.bv
        self.wo_k = self.wo.astype(jnp.bfloat16)
        self.bo_k = self.bo

    def __call__(self, query, key=None, value=None, return_attn=True):
        # TODO(synk): optional `mask` argument not implemented (default mask=None path).
        if key is None:
            key = query
        if value is None:
            value = query

        B, Sq, D = query.shape
        Sk = key.shape[1]

        if key is query and value is query:
            # Self-attention fast path: fused QKV projection (reads x once).
            q2, k2, v2 = qkv_projection(query.reshape(B * Sq, D),
                                        self.wq_k, self.wk_k, self.wv_k,
                                        self.bq_k, self.bk_k, self.bv_k)
        else:
            q2 = linear(query.reshape(B * Sq, D), self.wq_k, self.bq_k,
                        out_dtype=jnp.bfloat16)
            k2 = linear(key.reshape(B * Sk, D), self.wk_k, self.bk_k,
                        out_dtype=jnp.bfloat16)
            v2 = linear(value.reshape(B * Sk, D), self.wv_k, self.bv_k,
                        out_dtype=jnp.bfloat16)

        # No head transposes: heads stay packed along D; BlockSpecs slice them.
        qh = q2.reshape(B, Sq, D)
        kh = k2.reshape(B, Sk, D)
        vh = v2.reshape(B, Sk, D)

        attn_out, attn = scaled_dot_product_attention(
            qh, kh, vh, self.num_heads, return_attn=return_attn)

        out = linear(attn_out.reshape(B * Sq, D), self.wo_k, self.bo_k,
                     out_dtype=query.dtype).reshape(B, Sq, D)
        return out, attn


# ---------------------------- pure-JAX reference --------------------------------

def reference_forward(mha, query):
    B, S, D = query.shape
    H, d_k = mha.num_heads, mha.d_k
    x2 = query.reshape(B * S, D)
    q = (x2 @ mha.wq + mha.bq).reshape(B, S, H, d_k).transpose(0, 2, 1, 3)
    k = (x2 @ mha.wk + mha.bk).reshape(B, S, H, d_k).transpose(0, 2, 1, 3)
    v = (x2 @ mha.wv + mha.bv).reshape(B, S, H, d_k).transpose(0, 2, 1, 3)
    scores = jnp.einsum("bhqd,bhkd->bhqk", q, k) / math.sqrt(d_k)
    attn = jax.nn.softmax(scores, axis=-1)
    o = jnp.einsum("bhqk,bhkd->bhqd", attn, v).transpose(0, 2, 1, 3).reshape(B * S, D)
    out = (o @ mha.wo + mha.bo).reshape(B, S, D)
    return out, attn


if __name__ == "__main__":
    batch, seq, d_model, num_heads = 2, 8, 32, 4

    root = jax.random.PRNGKey(0)
    k_param, k_x = jax.random.split(root)

    mha = MultiHeadAttentionPallas(d_model, num_heads, k_param)
    x = jax.random.normal(k_x, (batch, seq, d_model), dtype=jnp.float32)

    out, attn = mha(x)
    out = jax.block_until_ready(out)
    attn = jax.block_until_ready(attn)

    ref_out, ref_attn = reference_forward(mha, x)
    assert out.shape == (batch, seq, d_model)
    assert attn.shape == (batch, num_heads, seq, seq)
    # bf16 weights/activations on the MXU + approx reciprocal + bf16 attention
    # weights loosen tolerances vs. the f32 reference.
    out_err = jnp.max(jnp.abs(out - ref_out))
    attn_err = jnp.max(jnp.abs(attn.astype(jnp.float32) - ref_attn))
    assert jnp.allclose(out, ref_out, atol=6e-2, rtol=6e-2), f"out mismatch: {out_err}"
    assert jnp.allclose(attn.astype(jnp.float32), ref_attn, atol=3e-2, rtol=3e-2), \
        f"attn mismatch: {attn_err}"

    print("KERNEL_OK")
</pallas_src>

<mosaic_0001>
module attributes {stable_mosaic.version = 11 : i64} {
  func.func @_qkv_proj_kernel(%arg0: i32, %arg1: memref<16x32xf32, #tpu.memory_space<vmem>>, %arg2: memref<32x32xbf16, #tpu.memory_space<vmem>>, %arg3: memref<32x32xbf16, #tpu.memory_space<vmem>>, %arg4: memref<32x32xbf16, #tpu.memory_space<vmem>>, %arg5: memref<1x32xf32, #tpu.memory_space<vmem>>, %arg6: memref<1x32xf32, #tpu.memory_space<vmem>>, %arg7: memref<1x32xf32, #tpu.memory_space<vmem>>, %arg8: memref<16x32xbf16, #tpu.memory_space<vmem>>, %arg9: memref<16x32xbf16, #tpu.memory_space<vmem>>, %arg10: memref<16x32xbf16, #tpu.memory_space<vmem>>) attributes {dimension_semantics = [#tpu.dimension_semantics<parallel>], iteration_bounds = array<i64: 1>, scalar_prefetch = 0 : i64, scratch_operands = 0 : i64, tpu.core_type = #tpu.core_type<tc>, window_params = [{transform_indices = @transform_0, window_bounds = array<i64: 16, 32>}, {pipeline_mode = #tpu.pipeline_mode<synchronous>, transform_indices = @transform_1, window_bounds = array<i64: 32, 32>}, {pipeline_mode = #tpu.pipeline_mode<synchronous>, transform_indices = @transform_2, window_bounds = array<i64: 32, 32>}, {pipeline_mode = #tpu.pipeline_mode<synchronous>, transform_indices = @transform_3, window_bounds = array<i64: 32, 32>}, {pipeline_mode = #tpu.pipeline_mode<synchronous>, transform_indices = @transform_4, window_bounds = array<i64: 1, 32>}, {pipeline_mode = #tpu.pipeline_mode<synchronous>, transform_indices = @transform_5, window_bounds = array<i64: 1, 32>}, {pipeline_mode = #tpu.pipeline_mode<synchronous>, transform_indices = @transform_6, window_bounds = array<i64: 1, 32>}, {transform_indices = @transform_7, window_bounds = array<i64: 16, 32>}, {transform_indices = @transform_8, window_bounds = array<i64: 16, 32>}, {transform_indices = @transform_9, window_bounds = array<i64: 16, 32>}]} {
    %c0 = arith.constant 0 : index
    %c0_0 = arith.constant 0 : index
    %0 = vector.load %arg1[%c0, %c0_0] : memref<16x32xf32, #tpu.memory_space<vmem>>, vector<16x32xf32>
    %1 = arith.truncf %0 : vector<16x32xf32> to vector<16x32xbf16>
    %c0_1 = arith.constant 0 : index
    %c0_2 = arith.constant 0 : index
    %2 = vector.load %arg2[%c0_1, %c0_2] : memref<32x32xbf16, #tpu.memory_space<vmem>>, vector<32x32xbf16>
    %cst = arith.constant dense<0.000000e+00> : vector<16x32xf32>
    %3 = tpu.matmul %1, %2, %cst {dimension_numbers = #tpu.dot_dimension_numbers<[1], [0], [0], [1], [0, 0, 1, 1], [], []>} : vector<16x32xbf16>, vector<32x32xbf16>, vector<16x32xf32> -> vector<16x32xf32>
    %c0_3 = arith.constant 0 : index
    %c0_4 = arith.constant 0 : index
    %4 = vector.load %arg5[%c0_3, %c0_4] : memref<1x32xf32, #tpu.memory_space<vmem>>, vector<1x32xf32>
    %5 = vector.broadcast %4 : vector<1x32xf32> to vector<16x32xf32>
    %6 = arith.addf %3, %5 : vector<16x32xf32>
    %7 = arith.truncf %6 : vector<16x32xf32> to vector<16x32xbf16>
    %c0_5 = arith.constant 0 : index
    %c0_6 = arith.constant 0 : index
    %8 = vector.load %arg8[%c0_5, %c0_6] : memref<16x32xbf16, #tpu.memory_space<vmem>>, vector<16x32xbf16>
    tpu.vector_store %arg8[%c0_5, %c0_6], %7 {strides = array<i32>} : memref<16x32xbf16, #tpu.memory_space<vmem>>, vector<16x32xbf16>,
    %c0_7 = arith.constant 0 : index
    %c0_8 = arith.constant 0 : index
    %9 = vector.load %arg3[%c0_7, %c0_8] : memref<32x32xbf16, #tpu.memory_space<vmem>>, vector<32x32xbf16>
    %cst_9 = arith.constant dense<0.000000e+00> : vector<16x32xf32>
    %10 = tpu.matmul %1, %9, %cst_9 {dimension_numbers = #tpu.dot_dimension_numbers<[1], [0], [0], [1], [0, 0, 1, 1], [], []>} : vector<16x32xbf16>, vector<32x32xbf16>, vector<16x32xf32> -> vector<16x32xf32>
    %c0_10 = arith.constant 0 : index
    %c0_11 = arith.constant 0 : index
    %11 = vector.load %arg6[%c0_10, %c0_11] : memref<1x32xf32, #tpu.memory_space<vmem>>, vector<1x32xf32>
    %12 = vector.broadcast %11 : vector<1x32xf32> to vector<16x32xf32>
    %13 = arith.addf %10, %12 : vector<16x32xf32>
    %14 = arith.truncf %13 : vector<16x32xf32> to vector<16x32xbf16>
    %c0_12 = arith.constant 0 : index
    %c0_13 = arith.constant 0 : index
    %15 = vector.load %arg9[%c0_12, %c0_13] : memref<16x32xbf16, #tpu.memory_space<vmem>>, vector<16x32xbf16>
    tpu.vector_store %arg9[%c0_12, %c0_13], %14 {strides = array<i32>} : memref<16x32xbf16, #tpu.memory_space<vmem>>, vector<16x32xbf16>,
    %c0_14 = arith.constant 0 : index
    %c0_15 = arith.constant 0 : index
    %16 = vector.load %arg4[%c0_14, %c0_15] : memref<32x32xbf16, #tpu.memory_space<vmem>>, vector<32x32xbf16>
    %cst_16 = arith.constant dense<0.000000e+00> : vector<16x32xf32>
    %17 = tpu.matmul %1, %16, %cst_16 {dimension_numbers = #tpu.dot_dimension_numbers<[1], [0], [0], [1], [0, 0, 1, 1], [], []>} : vector<16x32xbf16>, vector<32x32xbf16>, vector<16x32xf32> -> vector<16x32xf32>
    %c0_17 = arith.constant 0 : index
    %c0_18 = arith.constant 0 : index
    %18 = vector.load %arg7[%c0_17, %c0_18] : memref<1x32xf32, #tpu.memory_space<vmem>>, vector<1x32xf32>
    %19 = vector.broadcast %18 : vector<1x32xf32> to vector<16x32xf32>
    %20 = arith.addf %17, %19 : vector<16x32xf32>
    %21 = arith.truncf %20 : vector<16x32xf32> to vector<16x32xbf16>
    %c0_19 = arith.constant 0 : index
    %c0_20 = arith.constant 0 : index
    %22 = vector.load %arg10[%c0_19, %c0_20] : memref<16x32xbf16, #tpu.memory_space<vmem>>, vector<16x32xbf16>
    tpu.vector_store %arg10[%c0_19, %c0_20], %21 {strides = array<i32>} : memref<16x32xbf16, #tpu.memory_space<vmem>>, vector<16x32xbf16>,
    return
  }
  func.func @transform_0(%arg0: i32) -> (i32, i32) {
    %c0_i32 = arith.constant 0 : i32
    %c0_i32_0 = arith.constant 0 : i32
    return %arg0, %c0_i32 : i32, i32
  }
  func.func @transform_1(%arg0: i32) -> (i32, i32) {
    %c0_i32 = arith.constant 0 : i32
    %c0_i32_0 = arith.constant 0 : i32
    %c0_i32_1 = arith.constant 0 : i32
    return %c0_i32, %c0_i32_0 : i32, i32
  }
  func.func @transform_2(%arg0: i32) -> (i32, i32) {
    %c0_i32 = arith.constant 0 : i32
    %c0_i32_0 = arith.constant 0 : i32
    %c0_i32_1 = arith.constant 0 : i32
    return %c0_i32, %c0_i32_0 : i32, i32
  }
  func.func @transform_3(%arg0: i32) -> (i32, i32) {
    %c0_i32 = arith.constant 0 : i32
    %c0_i32_0 = arith.constant 0 : i32
    %c0_i32_1 = arith.constant 0 : i32
    return %c0_i32, %c0_i32_0 : i32, i32
  }
  func.func @transform_4(%arg0: i32) -> (i32, i32) {
    %c0_i32 = arith.constant 0 : i32
    %c0_i32_0 = arith.constant 0 : i32
    %c0_i32_1 = arith.constant 0 : i32
    return %c0_i32, %c0_i32_0 : i32, i32
  }
  func.func @transform_5(%arg0: i32) -> (i32, i32) {
    %c0_i32 = arith.constant 0 : i32
    %c0_i32_0 = arith.constant 0 : i32
    %c0_i32_1 = arith.constant 0 : i32
    return %c0_i32, %c0_i32_0 : i32, i32
  }
  func.func @transform_6(%arg0: i32) -> (i32, i32) {
    %c0_i32 = arith.constant 0 : i32
    %c0_i32_0 = arith.constant 0 : i32
    %c0_i32_1 = arith.constant 0 : i32
    return %c0_i32, %c0_i32_0 : i32, i32
  }
  func.func @transform_7(%arg0: i32) -> (i32, i32) {
    %c0_i32 = arith.constant 0 : i32
    %c0_i32_0 = arith.constant 0 : i32
    return %arg0, %c0_i32 : i32, i32
  }
  func.func @transform_8(%arg0: i32) -> (i32, i32) {
    %c0_i32 = arith.constant 0 : i32
    %c0_i32_0 = arith.constant 0 : i32
    return %arg0, %c0_i32 : i32, i32
  }
  func.func @transform_9(%arg0: i32) -> (i32, i32) {
    %c0_i32 = arith.constant 0 : i32
    %c0_i32_0 = arith.constant 0 : i32
    return %arg0, %c0_i32 : i32, i32
  }
}

</mosaic_0001>

<bundles_post_ra>
// kernel: tpu_custom_call.1
= control target key start
LH: loop header
LB: loop body
LE: loop exit
PB: predicated region body
PF: predicated region fallthrough
CT: control target
= control target key end

     0   :  { %15 = vsyncpa [#allocation3], 0  ;;  %s804_s0 = inlined_call_operand.hbm [shape: f32[16,32], index: 0, kind: input, shape index: {}]   ;;  %s805_s1 = inlined_call_operand.hbm [shape: bf16[32,32], index: 1, kind: input, shape index: {}]   ;;  %s806_s2 = inlined_call_operand.hbm [shape: bf16[32,32], index: 2, kind: input, shape index: {}]   ;;  %s807_s3 = inlined_call_operand.hbm [shape: bf16[32,32], index: 3, kind: input, shape index: {}]   ;;  %s808_s4 = inlined_call_operand.vmem [shape: f32[1,32], index: 4, kind: input, shape index: {}]   ;;  %s809_s5 = inlined_call_operand.vmem [shape: f32[1,32], index: 5, kind: input, shape index: {}]   ;;  %s810_s6 = inlined_call_operand.vmem [shape: f32[1,32], index: 6, kind: input, shape index: {}]   ;;  %s811_s7 = inlined_call_operand.hbm [shape: bf16[16,32], index: 7, kind: output, shape index: {0}]   ;;  %s812_s8 = inlined_call_operand.hbm [shape: bf16[16,32], index: 8, kind: output, shape index: {1}]   ;;  %s813_s9 = inlined_call_operand.hbm [shape: bf16[16,32], index: 9, kind: output, shape index: {2}]  }
   0x1   :  { %16 = vsyncpa [#allocation6], 0 }
   0x2   :  { %17 = vsyncpa [#allocation9], 0 }
   0x3   :  { %18 = vsyncpa [#allocation4], 0 }
   0x4   :  { %19 = vsyncpa [#allocation12], 0  ;;  %s607_s30 = smov [#allocation5]   ;;  %s443_s13 = scalar_lea.hbm %s805_s1, 256 }
   0x5   :  { %s37_s10 = sshll.u32 %s607_s30, 4  ;;  %p444_p0 = scmp.ne.s32.totalorder %s805_s1, %s443_s13  ;;  %s38_s10 = int_to_ptr.vmem [resolvable:$true] %s37_s10 }
   0x6   :  { %p447_p1 = scmp.lt.u32.totalorder %s443_s13, %s805_s1 }
   0x8   :  { %p449_p2 = pnand %p447_p1, %p444_p0 }
   0xa   :  { %452 = shalt.err (!%p449_p2)
}
   0xb   :  { %s453_s18 = scalar_lea.vmem %s38_s10, 256  ;;  %p458_p4 = scmp.lt.s32.totalorder %s38_s10, %s38_s10 }
   0xc   :  { %p454_p3 = scmp.ne.s32.totalorder %s38_s10, %s453_s18  ;;  %p459_p5 = scmp.lt.s32.totalorder %s453_s18, %s453_s18 }
   0xe   :  { %p460_p6 = por %p459_p5, %p458_p4 }
  0x10   :  { %p461_p7 = pnand %p460_p6, %p454_p3 }
  0x12   :  { %464 = shalt.err (!%p461_p7)
}
  0x13   :  { %s608_s19 = smov 64   ;;  %s609_s20 = smov 4  }
  0x14   :  { %43 = dma.hbm_to_vmem [thread:$0]  %s805_s1, 256, %s38_s10, [#allocation6], %s608_s19, %s608_s19, %s609_s20  }
  0x15   :  { %s610_s23 = smov [#allocation2]   ;;  %s465_s27 = scalar_lea.hbm %s804_s0, 256 }
  0x16   :  { %s25_s24 = sshll.u32 %s610_s23, 4  ;;  %p466_p8 = scmp.ne.s32.totalorder %s804_s0, %s465_s27  ;;  %s26_s24 = int_to_ptr.vmem [resolvable:$true] %s25_s24 }
  0x17   :  { %p469_p9 = scmp.lt.u32.totalorder %s465_s27, %s804_s0 }
  0x19   :  { %p471_p10 = pnand %p469_p9, %p466_p8 }
  0x1b   :  { %474 = shalt.err (!%p471_p10)
}
  0x1c   :  { %s475_s12 = scalar_lea.vmem %s26_s24, 256  ;;  %p480_p12 = scmp.lt.s32.totalorder %s26_s24, %s26_s24 }
  0x1d   :  { %p476_p11 = scmp.ne.s32.totalorder %s26_s24, %s475_s12  ;;  %p481_p13 = scmp.lt.s32.totalorder %s475_s12, %s475_s12 }
  0x1f   :  { %p482_p0 = por %p481_p13, %p480_p12 }
  0x21   :  { %p483_p1 = pnand %p482_p0, %p476_p11 }
  0x23   :  { %486 = shalt.err (!%p483_p1)
}
  0x24   :  { %s611_s1 = smov 128   ;;  %s612_s10 = smov 8  }
  0x25   :  { %31 = dma.hbm_to_vmem [thread:$0]  %s804_s0, 256, %s26_s24, [#allocation3], %s611_s1, %s611_s1, %s612_s10  }
  0x26   :  { %s613_s15 = smov [#allocation7]   ;;  %s614_s17 = smov [#allocation8]  }
  0x27   :  { %s49_s16 = sshll.u32 %s613_s15, 4  ;;  %s61_s18 = sshll.u32 %s614_s17, 4  ;;  %s50_s16 = int_to_ptr.vmem [resolvable:$true] %s49_s16  ;;  %s697_s18 = int_to_ptr.vmem [resolvable:$true] %s61_s18 }
  0x28   :  { %s487_s23 = scalar_lea.hbm %s806_s2, 256 }
  0x29   :  { %p488_p2 = scmp.ne.s32.totalorder %s806_s2, %s487_s23  ;;  %p491_p3 = scmp.lt.u32.totalorder %s487_s23, %s806_s2 }
  0x2b   :  { %p493_p4 = pnand %p491_p3, %p488_p2 }
  0x2d   :  { %496 = shalt.err (!%p493_p4)
}
  0x2e   :  { %s497_s0 = scalar_lea.vmem %s50_s16, 256  ;;  %p502_p6 = scmp.lt.s32.totalorder %s50_s16, %s50_s16 }
  0x2f   :  { %p498_p5 = scmp.ne.s32.totalorder %s50_s16, %s497_s0  ;;  %p503_p7 = scmp.lt.s32.totalorder %s497_s0, %s497_s0 }
  0x31   :  { %p504_p8 = por %p503_p7, %p502_p6 }
  0x33   :  { %p505_p9 = pnand %p504_p8, %p498_p5 }
  0x35   :  { %508 = shalt.err (!%p505_p9)
}
  0x36   :  { %55 = dma.hbm_to_vmem [thread:$0]  %s806_s2, 256, %s50_s16, [#allocation6], %s608_s19, %s608_s19, %s609_s20  }
  0x37   :  { %s509_s12 = scalar_lea.hbm %s807_s3, 256 }
  0x38   :  { %p510_p10 = scmp.ne.s32.totalorder %s807_s3, %s509_s12  ;;  %p513_p11 = scmp.lt.u32.totalorder %s509_s12, %s807_s3 }
  0x3a   :  { %p515_p12 = pnand %p513_p11, %p510_p10 }
  0x3c   :  { %518 = shalt.err (!%p515_p12)
}
  0x3d   :  { %s519_s15 = scalar_lea.vmem %s697_s18, 256  ;;  %p524_p0 = scmp.lt.s32.totalorder %s697_s18, %s697_s18 }
  0x3e   :  { %p520_p13 = scmp.ne.s32.totalorder %s697_s18, %s519_s15  ;;  %p525_p1 = scmp.lt.s32.totalorder %s519_s15, %s519_s15 }
  0x40   :  { %p526_p2 = por %p525_p1, %p524_p0 }
  0x42   :  { %p527_p3 = pnand %p526_p2, %p520_p13 }
  0x44   :  { %530 = shalt.err (!%p527_p3)
}
  0x45   :  { %67 = dma.hbm_to_vmem [thread:$0]  %s807_s3, 256, %s697_s18, [#allocation9], %s608_s19, %s608_s19, %s609_s20  }
  0x46   :  { %597 = dma.done.wait [#allocation3], 256  }
  0x47   :  { %598 = vsyncadd [#allocation3], 4294967040 }
  0x48   :  { %599 = dma.done.wait [#allocation6], 512  }
  0x49   :  { %600 = vsyncadd [#allocation6], 4294966784 }
  0x4a   :  { %601 = dma.done.wait [#allocation9], 256  }
  0x4b   :  { %602 = vsyncadd [#allocation9], 4294967040  ;;  %v615_v0 = vmov 0.0   ;;  %vm616_vm0 = vmmov 0   ;;  %v437_v1 = vld [vmem:[#allocation5] sm:$0xff]   ;;  %v438_v2 = vld [vmem:[#allocation5 + $0x8] sm:$0xff]  }
  0x4c   :  { %400 = vmatprep.subr.bf16.mxu0 %v615_v0  ;;  %408 = vmatprep.subr.bf16.mxu1 %v615_v0  ;;  %v439_v3 = vld [vmem:[#allocation7] sm:$0xff]   ;;  %v88_v5 = vld [vmem:[#allocation2 + $0x8] sm:$0xff]  ;;  %vm113_vm1 = vcmask 261120   ;;  %v440_v8 = vld [vmem:[#allocation8] sm:$0xff]   ;;  %vm166_vm2 = vcmask 257024   ;;  %s617_s22 = smov [#allocation10]  }
  0x4d   :  { %404 = vmatprep.mubr.msk.bf16.mxu0 %vm616_vm0, %v615_v0  ;;  %412 = vmatprep.mubr.msk.bf16.mxu1 %vm616_vm0, %v615_v0  ;;  %v87_v4 = vld [vmem:[#allocation2] sm:$0xff]  ;;  %v441_v7 = vld [vmem:[#allocation7 + $0x8] sm:$0xff]   ;;  %v442_v9 = vld [vmem:[#allocation8 + $0x8] sm:$0xff]   ;;  %s322_s23 = sshll.u32 %s617_s22, 4  ;;  %s618_s25 = smov [#allocation11]   ;;  %s323_s23 = int_to_ptr.vmem [resolvable:$true] %s322_s23 }
  0x4e   :  { %401 = vmatpush3.bf16.msra.mxu0 %v437_v1  ;;  %409 = vmatpush3.bf16.msra.mxu1 %v439_v3  ;;  %v89_v6 = vpack.c.bf16 %v88_v5, %v87_v4  ;;  %v367_v10 = vld [vmem:[%s808_s4] ss:$0 sm:$0xff]  ;;  %s334_s4 = sshll.u32 %s618_s25, 4  ;;  %s531_s27 = scalar_lea.vmem %s323_s23, 128  ;;  %s749_s4 = int_to_ptr.vmem [resolvable:$true] %s334_s4 }
  0x4f   :  { %402 = vmatprep.subr.bf16.mxu0 %v615_v0  ;;  %410 = vmatprep.subr.bf16.mxu1 %v615_v0  ;;  %v373_v12 = vld [vmem:[%s809_s5] ss:$0 sm:$0xff]  ;;  %p532_p4 = scmp.ne.s32.totalorder %s323_s23, %s531_s27  ;;  %p536_p5 = scmp.lt.s32.totalorder %s323_s23, %s323_s23 }
  0x50   :  { %v379_v27 = vld [vmem:[%s810_s6] ss:$0 sm:$0xff]  ;;  %p537_p6 = scmp.lt.s32.totalorder %s531_s27, %s531_s27 }
  0x52   :  { %403 = vmatpush3.bf16.msra.mxu0 %v438_v2  ;;  %411 = vmatpush3.bf16.msra.mxu1 %v441_v7  ;;  %p538_p7 = por %p537_p6, %p536_p5 }
  0x53   :  { %416 = vmatprep.subr.bf16.mxu0 %v615_v0 }
  0x54   :  { %p539_p8 = pnand %p538_p7, %p532_p4 }
  0x55   :  { %405 = vmatmul.mubr.msk.bf16.vlgmr.msra.gmra.mrb[0].mxu0 %vm113_vm1, %v89_v6  ;;  %413 = vmatmul.mubr.msk.bf16.vlgmr.msra.gmra.mrb[0].mxu1 %vm113_vm1, %v89_v6 }
  0x56   :  { %417 = vmatpush3.bf16.msra.mxu0 %v440_v8  ;;  %420 = vmatprep.mubr.msk.bf16.mxu0 %vm616_vm0, %v615_v0 }
  0x57   :  { %418 = vmatprep.subr.bf16.mxu0 %v615_v0 }
  0x5a   :  { %419 = vmatpush3.bf16.msra.mxu0 %v442_v9 }
  0x5d   :  { %421 = vmatmul.mubr.msk.bf16.vlgmr.msra.gmra.mrb[4].mxu0 %vm113_vm1, %v89_v6 }
 0x128   :  { %v151_v11 = vpop.f32.mrb[0].mxu0  ;;  %v226_v16 = vpop.f32.mrb[0].mxu1 }
 0x129   :  { %v152_v13 = vadd.f32 %v367_v10, %v151_v11  ;;  %v406_v14 = vpop.f32.mrb[1].mxu0  ;;  %v227_v20 = vadd.f32 %v373_v12, %v226_v16  ;;  %v414_v21 = vpop.f32.mrb[1].mxu1 }
 0x12a   :  { %v154_v15 = vpop.f32.mrb[2].mxu0  ;;  %v229_v22 = vpop.f32.mrb[2].mxu1 }
 0x12b   :  { %v385_v17 = vpack.c.bf16 %v152_v13, %v152_v13  ;;  %v155_v18 = vadd.f32 %v367_v10, %v154_v15  ;;  %v407_v19 = vpop.f32.mrb[3].mxu0  ;;  %v387_v24 = vpack.c.bf16 %v227_v20, %v227_v20  ;;  %v230_v25 = vadd.f32 %v373_v12, %v229_v22  ;;  %v415_v26 = vpop.f32.mrb[3].mxu1 }
 0x12d   :  { %v386_v23 = vpack.c.bf16 %v155_v18, %v155_v18  ;;  %167 = vst.msk [vmem:[#allocation10] sm:$0xf] %vm166_vm2, %v385_v17  ;;  %v388_v28 = vpack.c.bf16 %v230_v25, %v230_v25  ;;  %241 = vst.msk [vmem:[#allocation11] sm:$0xf] %vm166_vm2, %v387_v24 }
 0x12f   :  { %168 = vst.msk [vmem:[#allocation10 + $0x4] sm:$0xf] %vm166_vm2, %v386_v23 }
 0x130   :  { %v300_v29 = vpop.f32.mrb[4].mxu0 }
 0x131   :  { %542 = shalt.err (!%p539_p8)
}
 0x132   :  { %s543_s24 = scalar_lea.hbm %s811_s7, 128 }
 0x133   :  { %p544_p9 = scmp.ne.s32.totalorder %s811_s7, %s543_s24  ;;  %p547_p10 = scmp.lt.u32.totalorder %s543_s24, %s811_s7 }
 0x135   :  { %p549_p11 = pnand %p547_p10, %p544_p9 }
 0x137   :  { %552 = shalt.err (!%p549_p11)
}
 0x138   :  { %328 = dma.vmem_to_hbm [thread:$0]  %s323_s23, 128, %s811_s7, [#allocation4], %s608_s19, %s608_s19, %s609_s20   ;;  %v301_v30 = vadd.f32 %v379_v27, %v300_v29  ;;  %242 = vst.msk [vmem:[#allocation11 + $0x4] sm:$0xf] %vm166_vm2, %v388_v28  ;;  %v422_v31 = vpop.f32.mrb[5].mxu0 }
 0x139   :  { %s619_s10 = smov [#allocation13]   ;;  %v303_v32 = vpop.f32.mrb[6].mxu0  ;;  %s553_s14 = scalar_lea.vmem %s749_s4, 128 }
 0x13a   :  { %s346_s13 = sshll.u32 %s619_s10, 4  ;;  %p554_p12 = scmp.ne.s32.totalorder %s749_s4, %s553_s14  ;;  %s347_s13 = int_to_ptr.vmem [resolvable:$true] %s346_s13 }
 0x13b   :  { %p558_p13 = scmp.lt.s32.totalorder %s749_s4, %s749_s4  ;;  %p559_p0 = scmp.lt.s32.totalorder %s553_s14, %s553_s14 }
 0x13d   :  { %p560_p1 = por %p559_p0, %p558_p13 }
 0x13f   :  { %p561_p2 = pnand %p560_p1, %p554_p12 }
 0x141   :  { %564 = shalt.err (!%p561_p2)
}
 0x142   :  { %s565_s16 = scalar_lea.hbm %s812_s8, 128 }
 0x143   :  { %p566_p3 = scmp.ne.s32.totalorder %s812_s8, %s565_s16  ;;  %p569_p4 = scmp.lt.u32.totalorder %s565_s16, %s812_s8 }
 0x145   :  { %p571_p5 = pnand %p569_p4, %p566_p3 }
 0x147   :  { %574 = shalt.err (!%p571_p5)
}
 0x148   :  { %340 = dma.vmem_to_hbm [thread:$0]  %s749_s4, 128, %s812_s8, [#allocation12], %s608_s19, %s608_s19, %s609_s20   ;;  %v389_v33 = vpack.c.bf16 %v301_v30, %v301_v30  ;;  %v304_v34 = vadd.f32 %v379_v27, %v303_v32  ;;  %v423_v35 = vpop.f32.mrb[7].mxu0 }
 0x149   :  { %s575_s23 = scalar_lea.vmem %s347_s13, 128  ;;  %p580_p7 = scmp.lt.s32.totalorder %s347_s13, %s347_s13 }
 0x14a   :  { %315 = vst.msk [vmem:[#allocation13] sm:$0xf] %vm166_vm2, %v389_v33  ;;  %v390_v36 = vpack.c.bf16 %v304_v34, %v304_v34  ;;  %p576_p6 = scmp.ne.s32.totalorder %s347_s13, %s575_s23  ;;  %p581_p8 = scmp.lt.s32.totalorder %s575_s23, %s575_s23 }
 0x14c   :  { %316 = vst.msk [vmem:[#allocation13 + $0x4] sm:$0xf] %vm166_vm2, %v390_v36  ;;  %p582_p9 = por %p581_p8, %p580_p7 }
 0x14e   :  { %p583_p10 = pnand %p582_p9, %p576_p6 }
 0x150   :  { %586 = shalt.err (!%p583_p10)
}
 0x151   :  { %s587_s8 = scalar_lea.hbm %s813_s9, 128 }
 0x152   :  { %p588_p11 = scmp.ne.s32.totalorder %s813_s9, %s587_s8  ;;  %p591_p12 = scmp.lt.u32.totalorder %s587_s8, %s813_s9 }
 0x154   :  { %p593_p13 = pnand %p591_p12, %p588_p11 }
 0x156   :  { %596 = shalt.err (!%p593_p13)
}
 0x157   :  { %352 = dma.vmem_to_hbm [thread:$0]  %s347_s13, 128, %s813_s9, [#allocation12], %s608_s19, %s608_s19, %s609_s20  }
 0x158   :  { %603 = dma.done.wait [#allocation4], 128  }
 0x159   :  { %604 = vsyncadd [#allocation4], 4294967168 }
 0x15a   :  { %605 = dma.done.wait [#allocation12], 256  }
 0x15b   :  { %606 = vsyncadd [#allocation12], 4294967040 }
 0x15c   :  { %362 = vsyncpa [#allocation3], 1 }
 0x15d   :  { %363 = vsyncpa [#allocation6], 1 }
 0x15e   :  { %364 = vsyncpa [#allocation9], 1 }
 0x15f   :  { %365 = vsyncpa [#allocation4], 1 }
 0x160   :  { %366 = vsyncpa [#allocation12], 1 }

</bundles_post_ra>
